<compile_context>
chip_gen: v5e
topology: v5e:2x2
jax: 0.10.0
libtpu: 0.0.40
codegen_flags: <defaults>
</compile_context>

<pallas_src>
import jax
import jax.numpy as jnp
from jax import lax
from jax.experimental import pallas as pl
from jax.experimental.pallas import tpu as pltpu

_BN_EPS = 1e-5
_MAX_BATCH_TILE = 1024          # <=1024 keeps v7x (64 MiB VMEM) comfortable; fine on v5e/v6e too


def _round_up(n, m):
    return ((n + m - 1) // m) * m


# ------------------------------ fused Pallas kernel -------------------------------

def _make_fused_kernel(F, B_tile, total_pad, branch_FE, n_hidden):
    n_branch = len(branch_FE)
    inv_nb = 1.0 / float(n_branch)

    def kernel(*refs):
        idx_ref = refs[0]                                 # (B_tile, F) int32, offsets pre-added
        tab_ref = refs[1]                                 # (total_pad, sum_b F*E_b) merged table
        pos = 2
        branch = []
        for _ in range(n_branch):
            branch.append(refs[pos:pos + 3])              # (kron, w_big, bias)
            pos += 3
        hidden = []
        for _ in range(n_hidden):
            hidden.append(refs[pos:pos + 2])              # (wt, b)
            pos += 2
        ow_ref, ob_ref = refs[pos], refs[pos + 1]
        o_ref = refs[pos + 2]

        # --- one-hot (B_tile, total_pad): fields occupy disjoint index ranges, so the per-field
        #     matches can simply be summed into a single row-selection matrix (no concatenate,
        #     F x smaller than the old field-major one-hot). ---
        iota = lax.broadcasted_iota(jnp.int32, (B_tile, total_pad), 1)
        oh = (iota == idx_ref[:, 0:1]).astype(jnp.float32)
        for f in range(1, F):
            oh = oh + (iota == idx_ref[:, f:f + 1]).astype(jnp.float32)

        # --- merged embedding gather for every branch and every field: ONE lane-dense MXU matmul ---
        emb_all = jnp.dot(oh, tab_ref[...], preferred_element_type=jnp.float32)   # (B_tile, sum F*E)

        # --- per-branch NFwFM + folded BN + branch Linear + ReLU, accumulated for the branch mean ---
        acc = None
        off = 0
        for (k_ref, w_ref, b_ref), FE in zip(branch, branch_FE):
            e = emb_all[:, off:off + FE]                  # (B_tile, F*E) lane-aligned column slice
            off += FE
            # u[b, i*E + ee] = sum_j w[i, j] * v[b, j, ee]   (MXU, K = N = F*E)
            u = jnp.dot(e, k_ref[...], preferred_element_type=jnp.float32)
            t = e * u                                     # fully lane-dense VPU multiply
            # field-sum + BN(eval) + branch Linear folded into one matmul (K = F*E)
            h = jnp.dot(t, w_ref[...], preferred_element_type=jnp.float32) + b_ref[...]
            h = jnp.maximum(h, 0.0)
            acc = h if acc is None else acc + h
        h = acc * inv_nb                                  # torch.stack(..., -1).mean(-1)

        for (wt_ref, b_ref) in hidden:                    # hidden MLP layers (BN folded into wt/b)
            h = jnp.dot(h, wt_ref[...], preferred_element_type=jnp.float32) + b_ref[...]
            h = jnp.maximum(h, 0.0)

        # final (d_last -> 1) projection on the VPU/XLU instead of an N=1 MXU matmul
        p = jnp.sum(h * ow_ref[...], axis=-1, keepdims=True) + ob_ref[...]
        o_ref[...] = 1.0 / (1.0 + jnp.exp(-p))            # sigmoid (exp lands on the EUP slot)

    return kernel


# --------------------------------- forward wrapper ---------------------------------

def multi_nfwfm_forward(x, params):
    B, F = x.shape
    offsets = params["offsets"]
    idx = (x + offsets[None, :]).astype(jnp.int32)

    # Batch tiling: single tile for tiny batches, exactly 2 parallel tiles for mid-size batches
    # (keeps both v7x TensorCores busy), 1024-row tiles for large batches.
    if B <= 64:
        B_tile = _round_up(B, 8)
        Bp = B_tile
    elif B <= 2 * _MAX_BATCH_TILE:
        B_tile = _round_up((B + 1) // 2, 8)
        Bp = 2 * B_tile
    else:
        B_tile = _MAX_BATCH_TILE
        Bp = _round_up(B, B_tile)
    if Bp != B:
        idx = jnp.pad(idx, ((0, Bp - B), (0, 0)))         # padded rows produce garbage, sliced off

    branches = params["branches"]
    total = branches[0]["emb_table"].shape[0]
    total_pad = _round_up(total, 8)

    # ---------- tiny host/XLA-side weight prep (folded BN, kron matrices, merged table) ----------
    r = jnp.arange(total_pad, dtype=jnp.int32)
    fid = jnp.sum((r[:, None] >= offsets[None, :]).astype(jnp.int32), axis=1) - 1    # field of row r
    valid = (r < total)
    field_oh = ((fid[:, None] == jnp.arange(F, dtype=jnp.int32)[None, :])
                & valid[:, None]).astype(jnp.float32)                                 # (total_pad, F)

    tab_blocks, branch_FE = [], []
    kron_list, wbig_list, bias_list = [], [], []
    for bp in branches:
        tab = bp["emb_table"]                             # (total, E)
        E = tab.shape[1]
        if total_pad != total:
            tab = jnp.pad(tab, ((0, total_pad - total), (0, 0)))
        # expanded table: column block f holds the branch table rows of field f, zero elsewhere,
        # so   one_hot @ expanded   yields the batch-major (B, F*E) embedding layout directly.
        texp_b = (tab[:, None, :] * field_oh[:, :, None]).reshape(total_pad, F * E)
        tab_blocks.append(texp_b)
        branch_FE.append(F * E)

        # kron(w^T, I_E): (emb @ K)[b, i*E+e] = sum_j w[i, j] * v[b, j, e]
        K = jnp.kron(bp["fwfm_w"].T, jnp.eye(E, dtype=jnp.float32))                  # (F*E, F*E)
        kron_list.append(K)

        # Fold BN1 (pre-linear) and BN2 (post-linear) into the branch Linear; replicate F times so
        # the sum over fields and the E-contraction become a single (F*E, H0) matmul.
        wt_f = (bp["bn1_scale"][:, None] * bp["lin_wt"]) * bp["lin_scale"][None, :]  # (E, H0)
        w_big = jnp.tile(wt_f, (F, 1))                                               # (F*E, H0)
        b_f = ((bp["bn1_shift"] @ bp["lin_wt"]) * bp["lin_scale"] + bp["lin_shift"]).reshape(1, -1)
        wbig_list.append(w_big)
        bias_list.append(b_f)

    tab_all = jnp.concatenate(tab_blocks, axis=1)         # (total_pad, sum_b F*E_b)

    # ----------------------------------- pallas_call plumbing -----------------------------------
    ins = [idx, tab_all]
    in_specs = [pl.BlockSpec((B_tile, F), lambda t: (t, 0)),
                pl.BlockSpec(tab_all.shape, lambda t: (0, 0))]

    for K, w_big, b_f in zip(kron_list, wbig_list, bias_list):
        ins += [K, w_big, b_f]
        in_specs += [pl.BlockSpec(K.shape, lambda t: (0, 0)),
                     pl.BlockSpec(w_big.shape, lambda t: (0, 0)),
                     pl.BlockSpec(b_f.shape, lambda t: (0, 0))]

    for layer in params["mlp_hidden"]:
        wt_f = layer["wt"] * layer["scale"][None, :]
        b_f = layer["shift"].reshape(1, -1)
        ins += [wt_f, b_f]
        in_specs += [pl.BlockSpec(wt_f.shape, lambda t: (0, 0)),
                     pl.BlockSpec(b_f.shape, lambda t: (0, 0))]

    ow_row = (params["out_wt"] * params["out_scale"][None, :]).T                     # (1, d_last)
    ob = params["out_shift"].reshape(1, 1)
    ins += [ow_row, ob]
    in_specs += [pl.BlockSpec(ow_row.shape, lambda t: (0, 0)),
                 pl.BlockSpec(ob.shape, lambda t: (0, 0))]

    kernel = _make_fused_kernel(F, B_tile, total_pad, tuple(branch_FE),
                                n_hidden=len(params["mlp_hidden"]))

    out = pl.pallas_call(
        kernel,
        out_shape=jax.ShapeDtypeStruct((Bp, 1), jnp.float32),
        grid=(Bp // B_tile,),
        in_specs=in_specs,
        out_specs=pl.BlockSpec((B_tile, 1), lambda t: (t, 0)),
        compiler_params=pltpu.CompilerParams(
            dimension_semantics=("parallel",),
            vmem_limit_bytes=32 * 1024 * 1024),
    )(*ins)
    return out[:B, 0]                                      # sigmoid(p.squeeze(1))


# ------------------------------ parameters / reference ------------------------------

def init_params(key, field_dims, embed_dims, mlp_dims):
    F = len(field_dims)
    total = int(sum(field_dims))
    offs, acc = [], 0
    for d in field_dims:
        offs.append(acc)
        acc += d
    offsets = jnp.array(offs, dtype=jnp.int32)

    bn_s = 1.0 / jnp.sqrt(1.0 + _BN_EPS)  # fresh BN running stats: mean=0, var=1, gamma=1, beta=0

    branches = []
    for E in embed_dims:
        key, k1, k2, k3, k4 = jax.random.split(key, 5)
        emb_table = 0.1 * jax.random.normal(k1, (total, E), jnp.float32)
        fwfm_w = jax.random.normal(k2, (F, F), jnp.float32)           # nn.Parameter randn(1,F,F)
        lin_w = (1.0 / jnp.sqrt(E)) * jax.random.normal(k3, (mlp_dims[0], E), jnp.float32)
        lin_b = 0.1 * jax.random.normal(k4, (mlp_dims[0],), jnp.float32)
        branches.append(dict(
            emb_table=emb_table,
            fwfm_w=fwfm_w,
            bn1_scale=jnp.full((E,), bn_s, jnp.float32),
            bn1_shift=jnp.zeros((E,), jnp.float32),
            lin_wt=lin_w.T,                                            # (E, mlp_dims[0])
            lin_scale=jnp.full((mlp_dims[0],), bn_s, jnp.float32),     # folded BN of branch MLP layer
            lin_shift=lin_b * bn_s,
        ))

    mlp_hidden = []
    din = mlp_dims[0]
    for dout in mlp_dims[1:]:
        key, kw, kb = jax.random.split(key, 3)
        w = (1.0 / jnp.sqrt(din)) * jax.random.normal(kw, (dout, din), jnp.float32)
        b = 0.1 * jax.random.normal(kb, (dout,), jnp.float32)
        mlp_hidden.append(dict(wt=w.T, scale=jnp.full((dout,), bn_s, jnp.float32), shift=b * bn_s))
        din = dout

    key, kw, kb = jax.random.split(key, 3)
    out_w = (1.0 / jnp.sqrt(din)) * jax.random.normal(kw, (1, din), jnp.float32)
    out_b = 0.1 * jax.random.normal(kb, (1,), jnp.float32)

    return dict(offsets=offsets, branches=branches, mlp_hidden=mlp_hidden,
                out_wt=out_w.T, out_scale=jnp.ones((1,), jnp.float32), out_shift=out_b)


def reference_forward(x, params):
    """Pure-JAX reference mirroring the PyTorch eval-mode forward."""
    outs = []
    for bp in params["branches"]:
        emb = bp["emb_table"][x + params["offsets"][None, :]]
        u = jnp.einsum('ij,bje->bie', bp["fwfm_w"], emb)
        h = jnp.sum(emb * u, axis=1)
        h = h * bp["bn1_scale"] + bp["bn1_shift"]
        h = jnp.maximum(h @ bp["lin_wt"] * bp["lin_scale"] + bp["lin_shift"], 0.0)
        outs.append(h)
    h = jnp.mean(jnp.stack(outs, axis=-1), axis=-1)
    for layer in params["mlp_hidden"]:
        h = jnp.maximum(h @ layer["wt"] * layer["scale"] + layer["shift"], 0.0)
    p = h @ params["out_wt"] * params["out_scale"] + params["out_shift"]
    return jax.nn.sigmoid(p)[:, 0]


if __name__ == "__main__":
    field_dims = (5, 7, 11, 3, 9, 6, 4, 8)   # num_fields = 8
    embed_dims = (16, 32)
    mlp_dims = (64, 32, 16)
    dropouts = (0.2, 0.2)                     # unused at inference (eval mode)
    B = 8

    key = jax.random.PRNGKey(0)
    key, pkey, xkey = jax.random.split(key, 3)
    params = init_params(pkey, field_dims, embed_dims, mlp_dims)

    cols = []
    for d in field_dims:
        xkey, k = jax.random.split(xkey)
        cols.append(jax.random.randint(k, (B,), 0, d, dtype=jnp.int32))
    x = jnp.stack(cols, axis=1)               # (B, F) int32 indices

    fwd = jax.jit(multi_nfwfm_forward)
    out = jax.block_until_ready(fwd(x, params))
    ref = reference_forward(x, params)

    assert out.shape == (B,)
    assert jnp.allclose(out, ref, atol=1e-4, rtol=1e-4), (out, ref)
    print("KERNEL_OK")
</pallas_src>

<mosaic_0001>
module attributes {stable_mosaic.version = 11 : i64} {
  func.func @kernel(%arg0: i32, %arg1: memref<8x8xi32, #tpu.memory_space<vmem>>, %arg2: memref<56x384xf32, #tpu.memory_space<vmem>>, %arg3: memref<128x128xf32, #tpu.memory_space<vmem>>, %arg4: memref<128x64xf32, #tpu.memory_space<vmem>>, %arg5: memref<1x64xf32, #tpu.memory_space<vmem>>, %arg6: memref<256x256xf32, #tpu.memory_space<vmem>>, %arg7: memref<256x64xf32, #tpu.memory_space<vmem>>, %arg8: memref<1x64xf32, #tpu.memory_space<vmem>>, %arg9: memref<64x32xf32, #tpu.memory_space<vmem>>, %arg10: memref<1x32xf32, #tpu.memory_space<vmem>>, %arg11: memref<32x16xf32, #tpu.memory_space<vmem>>, %arg12: memref<1x16xf32, #tpu.memory_space<vmem>>, %arg13: memref<1x16xf32, #tpu.memory_space<vmem>>, %arg14: memref<1x1xf32, #tpu.memory_space<vmem>>, %arg15: memref<8x1xf32, #tpu.memory_space<vmem>>) attributes {dimension_semantics = [#tpu.dimension_semantics<parallel>], iteration_bounds = array<i64: 1>, scalar_prefetch = 0 : i64, scratch_operands = 0 : i64, tpu.core_type = #tpu.core_type<tc>, window_params = [{transform_indices = @transform_0, window_bounds = array<i64: 8, 8>}, {pipeline_mode = #tpu.pipeline_mode<synchronous>, transform_indices = @transform_1, window_bounds = array<i64: 56, 384>}, {pipeline_mode = #tpu.pipeline_mode<synchronous>, transform_indices = @transform_2, window_bounds = array<i64: 128, 128>}, {pipeline_mode = #tpu.pipeline_mode<synchronous>, transform_indices = @transform_3, window_bounds = array<i64: 128, 64>}, {pipeline_mode = #tpu.pipeline_mode<synchronous>, transform_indices = @transform_4, window_bounds = array<i64: 1, 64>}, {pipeline_mode = #tpu.pipeline_mode<synchronous>, transform_indices = @transform_5, window_bounds = array<i64: 256, 256>}, {pipeline_mode = #tpu.pipeline_mode<synchronous>, transform_indices = @transform_6, window_bounds = array<i64: 256, 64>}, {pipeline_mode = #tpu.pipeline_mode<synchronous>, transform_indices = @transform_7, window_bounds = array<i64: 1, 64>}, {pipeline_mode = #tpu.pipeline_mode<synchronous>, transform_indices = @transform_8, window_bounds = array<i64: 64, 32>}, {pipeline_mode = #tpu.pipeline_mode<synchronous>, transform_indices = @transform_9, window_bounds = array<i64: 1, 32>}, {pipeline_mode = #tpu.pipeline_mode<synchronous>, transform_indices = @transform_10, window_bounds = array<i64: 32, 16>}, {pipeline_mode = #tpu.pipeline_mode<synchronous>, transform_indices = @transform_11, window_bounds = array<i64: 1, 16>}, {pipeline_mode = #tpu.pipeline_mode<synchronous>, transform_indices = @transform_12, window_bounds = array<i64: 1, 16>}, {pipeline_mode = #tpu.pipeline_mode<synchronous>, transform_indices = @transform_13, window_bounds = array<i64: 1, 1>}, {transform_indices = @transform_14, window_bounds = array<i64: 8, 1>}]} {
    %0 = tpu.iota {dimensions = array<i32: 1>} : vector<8x56xi32>
    %c0 = arith.constant 0 : index
    %c0_0 = arith.constant 0 : index
    %1 = vector.load %arg1[%c0, %c0_0] : memref<8x8xi32, #tpu.memory_space<vmem>>, vector<8x1xi32>
    %2 = vector.broadcast %1 : vector<8x1xi32> to vector<8x56xi32>
    %3 = arith.cmpi eq, %0, %2 : vector<8x56xi32>
    %4 = arith.extui %3 : vector<8x56xi1> to vector<8x56xi32>
    %5 = arith.sitofp %4 : vector<8x56xi32> to vector<8x56xf32>
    %c0_1 = arith.constant 0 : index
    %c1 = arith.constant 1 : index
    %6 = vector.load %arg1[%c0_1, %c1] : memref<8x8xi32, #tpu.memory_space<vmem>>, vector<8x1xi32>
    %7 = vector.broadcast %6 : vector<8x1xi32> to vector<8x56xi32>
    %8 = arith.cmpi eq, %0, %7 : vector<8x56xi32>
    %9 = arith.extui %8 : vector<8x56xi1> to vector<8x56xi32>
    %10 = arith.sitofp %9 : vector<8x56xi32> to vector<8x56xf32>
    %11 = arith.addf %5, %10 : vector<8x56xf32>
    %c0_2 = arith.constant 0 : index
    %c2 = arith.constant 2 : index
    %12 = vector.load %arg1[%c0_2, %c2] : memref<8x8xi32, #tpu.memory_space<vmem>>, vector<8x1xi32>
    %13 = vector.broadcast %12 : vector<8x1xi32> to vector<8x56xi32>
    %14 = arith.cmpi eq, %0, %13 : vector<8x56xi32>
    %15 = arith.extui %14 : vector<8x56xi1> to vector<8x56xi32>
    %16 = arith.sitofp %15 : vector<8x56xi32> to vector<8x56xf32>
    %17 = arith.addf %11, %16 : vector<8x56xf32>
    %c0_3 = arith.constant 0 : index
    %c3 = arith.constant 3 : index
    %18 = vector.load %arg1[%c0_3, %c3] : memref<8x8xi32, #tpu.memory_space<vmem>>, vector<8x1xi32>
    %19 = vector.broadcast %18 : vector<8x1xi32> to vector<8x56xi32>
    %20 = arith.cmpi eq, %0, %19 : vector<8x56xi32>
    %21 = arith.extui %20 : vector<8x56xi1> to vector<8x56xi32>
    %22 = arith.sitofp %21 : vector<8x56xi32> to vector<8x56xf32>
    %23 = arith.addf %17, %22 : vector<8x56xf32>
    %c0_4 = arith.constant 0 : index
    %c4 = arith.constant 4 : index
    %24 = vector.load %arg1[%c0_4, %c4] : memref<8x8xi32, #tpu.memory_space<vmem>>, vector<8x1xi32>
    %25 = vector.broadcast %24 : vector<8x1xi32> to vector<8x56xi32>
    %26 = arith.cmpi eq, %0, %25 : vector<8x56xi32>
    %27 = arith.extui %26 : vector<8x56xi1> to vector<8x56xi32>
    %28 = arith.sitofp %27 : vector<8x56xi32> to vector<8x56xf32>
    %29 = arith.addf %23, %28 : vector<8x56xf32>
    %c0_5 = arith.constant 0 : index
    %c5 = arith.constant 5 : index
    %30 = vector.load %arg1[%c0_5, %c5] : memref<8x8xi32, #tpu.memory_space<vmem>>, vector<8x1xi32>
    %31 = vector.broadcast %30 : vector<8x1xi32> to vector<8x56xi32>
    %32 = arith.cmpi eq, %0, %31 : vector<8x56xi32>
    %33 = arith.extui %32 : vector<8x56xi1> to vector<8x56xi32>
    %34 = arith.sitofp %33 : vector<8x56xi32> to vector<8x56xf32>
    %35 = arith.addf %29, %34 : vector<8x56xf32>
    %c0_6 = arith.constant 0 : index
    %c6 = arith.constant 6 : index
    %36 = vector.load %arg1[%c0_6, %c6] : memref<8x8xi32, #tpu.memory_space<vmem>>, vector<8x1xi32>
    %37 = vector.broadcast %36 : vector<8x1xi32> to vector<8x56xi32>
    %38 = arith.cmpi eq, %0, %37 : vector<8x56xi32>
    %39 = arith.extui %38 : vector<8x56xi1> to vector<8x56xi32>
    %40 = arith.sitofp %39 : vector<8x56xi32> to vector<8x56xf32>
    %41 = arith.addf %35, %40 : vector<8x56xf32>
    %c0_7 = arith.constant 0 : index
    %c7 = arith.constant 7 : index
    %42 = vector.load %arg1[%c0_7, %c7] : memref<8x8xi32, #tpu.memory_space<vmem>>, vector<8x1xi32>
    %43 = vector.broadcast %42 : vector<8x1xi32> to vector<8x56xi32>
    %44 = arith.cmpi eq, %0, %43 : vector<8x56xi32>
    %45 = arith.extui %44 : vector<8x56xi1> to vector<8x56xi32>
    %46 = arith.sitofp %45 : vector<8x56xi32> to vector<8x56xf32>
    %47 = arith.addf %41, %46 : vector<8x56xf32>
    %c0_8 = arith.constant 0 : index
    %c0_9 = arith.constant 0 : index
    %48 = vector.load %arg2[%c0_8, %c0_9] : memref<56x384xf32, #tpu.memory_space<vmem>>, vector<56x384xf32>
    %cst = arith.constant dense<0.000000e+00> : vector<8x384xf32>
    %49 = tpu.matmul %47, %48, %cst {dimension_numbers = #tpu.dot_dimension_numbers<[1], [0], [0], [1], [0, 0, 1, 1], [], []>} : vector<8x56xf32>, vector<56x384xf32>, vector<8x384xf32> -> vector<8x384xf32>
    %50 = vector.extract_strided_slice %49 {offsets = [0, 0], sizes = [8, 128], strides = [1, 1]} : vector<8x384xf32> to vector<8x128xf32>
    %c0_10 = arith.constant 0 : index
    %c0_11 = arith.constant 0 : index
    %51 = vector.load %arg3[%c0_10, %c0_11] : memref<128x128xf32, #tpu.memory_space<vmem>>, vector<128x128xf32>
    %cst_12 = arith.constant dense<0.000000e+00> : vector<8x128xf32>
    %52 = tpu.matmul %50, %51, %cst_12 {dimension_numbers = #tpu.dot_dimension_numbers<[1], [0], [0], [1], [0, 0, 1, 1], [], []>} : vector<8x128xf32>, vector<128x128xf32>, vector<8x128xf32> -> vector<8x128xf32>
    %53 = arith.mulf %50, %52 : vector<8x128xf32>
    %c0_13 = arith.constant 0 : index
    %c0_14 = arith.constant 0 : index
    %54 = vector.load %arg4[%c0_13, %c0_14] : memref<128x64xf32, #tpu.memory_space<vmem>>, vector<128x64xf32>
    %cst_15 = arith.constant dense<0.000000e+00> : vector<8x64xf32>
    %55 = tpu.matmul %53, %54, %cst_15 {dimension_numbers = #tpu.dot_dimension_numbers<[1], [0], [0], [1], [0, 0, 1, 1], [], []>} : vector<8x128xf32>, vector<128x64xf32>, vector<8x64xf32> -> vector<8x64xf32>
    %c0_16 = arith.constant 0 : index
    %c0_17 = arith.constant 0 : index
    %56 = vector.load %arg5[%c0_16, %c0_17] : memref<1x64xf32, #tpu.memory_space<vmem>>, vector<1x64xf32>
    %57 = vector.broadcast %56 : vector<1x64xf32> to vector<8x64xf32>
    %58 = arith.addf %55, %57 : vector<8x64xf32>
    %cst_18 = arith.constant 0.000000e+00 : f32
    %59 = vector.broadcast %cst_18 : f32 to vector<8x64xf32>
    %60 = arith.maximumf %58, %59 : vector<8x64xf32>
    %61 = vector.extract_strided_slice %49 {offsets = [0, 128], sizes = [8, 256], strides = [1, 1]} : vector<8x384xf32> to vector<8x256xf32>
    %c0_19 = arith.constant 0 : index
    %c0_20 = arith.constant 0 : index
    %62 = vector.load %arg6[%c0_19, %c0_20] : memref<256x256xf32, #tpu.memory_space<vmem>>, vector<256x256xf32>
    %cst_21 = arith.constant dense<0.000000e+00> : vector<8x256xf32>
    %63 = tpu.matmul %61, %62, %cst_21 {dimension_numbers = #tpu.dot_dimension_numbers<[1], [0], [0], [1], [0, 0, 1, 1], [], []>} : vector<8x256xf32>, vector<256x256xf32>, vector<8x256xf32> -> vector<8x256xf32>
    %64 = arith.mulf %61, %63 : vector<8x256xf32>
    %c0_22 = arith.constant 0 : index
    %c0_23 = arith.constant 0 : index
    %65 = vector.load %arg7[%c0_22, %c0_23] : memref<256x64xf32, #tpu.memory_space<vmem>>, vector<256x64xf32>
    %cst_24 = arith.constant dense<0.000000e+00> : vector<8x64xf32>
    %66 = tpu.matmul %64, %65, %cst_24 {dimension_numbers = #tpu.dot_dimension_numbers<[1], [0], [0], [1], [0, 0, 1, 1], [], []>} : vector<8x256xf32>, vector<256x64xf32>, vector<8x64xf32> -> vector<8x64xf32>
    %c0_25 = arith.constant 0 : index
    %c0_26 = arith.constant 0 : index
    %67 = vector.load %arg8[%c0_25, %c0_26] : memref<1x64xf32, #tpu.memory_space<vmem>>, vector<1x64xf32>
    %68 = vector.broadcast %67 : vector<1x64xf32> to vector<8x64xf32>
    %69 = arith.addf %66, %68 : vector<8x64xf32>
    %cst_27 = arith.constant 0.000000e+00 : f32
    %70 = vector.broadcast %cst_27 : f32 to vector<8x64xf32>
    %71 = arith.maximumf %69, %70 : vector<8x64xf32>
    %72 = arith.addf %60, %71 : vector<8x64xf32>
    %cst_28 = arith.constant 5.000000e-01 : f32
    %73 = vector.broadcast %cst_28 : f32 to vector<8x64xf32>
    %74 = arith.mulf %72, %73 : vector<8x64xf32>
    %c0_29 = arith.constant 0 : index
    %c0_30 = arith.constant 0 : index
    %75 = vector.load %arg9[%c0_29, %c0_30] : memref<64x32xf32, #tpu.memory_space<vmem>>, vector<64x32xf32>
    %cst_31 = arith.constant dense<0.000000e+00> : vector<8x32xf32>
    %76 = tpu.matmul %74, %75, %cst_31 {dimension_numbers = #tpu.dot_dimension_numbers<[1], [0], [0], [1], [0, 0, 1, 1], [], []>} : vector<8x64xf32>, vector<64x32xf32>, vector<8x32xf32> -> vector<8x32xf32>
    %c0_32 = arith.constant 0 : index
    %c0_33 = arith.constant 0 : index
    %77 = vector.load %arg10[%c0_32, %c0_33] : memref<1x32xf32, #tpu.memory_space<vmem>>, vector<1x32xf32>
    %78 = vector.broadcast %77 : vector<1x32xf32> to vector<8x32xf32>
    %79 = arith.addf %76, %78 : vector<8x32xf32>
    %cst_34 = arith.constant 0.000000e+00 : f32
    %80 = vector.broadcast %cst_34 : f32 to vector<8x32xf32>
    %81 = arith.maximumf %79, %80 : vector<8x32xf32>
    %c0_35 = arith.constant 0 : index
    %c0_36 = arith.constant 0 : index
    %82 = vector.load %arg11[%c0_35, %c0_36] : memref<32x16xf32, #tpu.memory_space<vmem>>, vector<32x16xf32>
    %cst_37 = arith.constant dense<0.000000e+00> : vector<8x16xf32>
    %83 = tpu.matmul %81, %82, %cst_37 {dimension_numbers = #tpu.dot_dimension_numbers<[1], [0], [0], [1], [0, 0, 1, 1], [], []>} : vector<8x32xf32>, vector<32x16xf32>, vector<8x16xf32> -> vector<8x16xf32>
    %c0_38 = arith.constant 0 : index
    %c0_39 = arith.constant 0 : index
    %84 = vector.load %arg12[%c0_38, %c0_39] : memref<1x16xf32, #tpu.memory_space<vmem>>, vector<1x16xf32>
    %85 = vector.broadcast %84 : vector<1x16xf32> to vector<8x16xf32>
    %86 = arith.addf %83, %85 : vector<8x16xf32>
    %cst_40 = arith.constant 0.000000e+00 : f32
    %87 = vector.broadcast %cst_40 : f32 to vector<8x16xf32>
    %88 = arith.maximumf %86, %87 : vector<8x16xf32>
    %c0_41 = arith.constant 0 : index
    %c0_42 = arith.constant 0 : index
    %89 = vector.load %arg13[%c0_41, %c0_42] : memref<1x16xf32, #tpu.memory_space<vmem>>, vector<1x16xf32>
    %90 = vector.broadcast %89 : vector<1x16xf32> to vector<8x16xf32>
    %91 = arith.mulf %88, %90 : vector<8x16xf32>
    %cst_43 = arith.constant dense<0.000000e+00> : vector<8xf32>
    %92 = vector.multi_reduction <add>, %91, %cst_43 [1] : vector<8x16xf32> to vector<8xf32>
    %93 = vector.shape_cast %92 : vector<8xf32> to vector<8x1xf32>
    %c0_44 = arith.constant 0 : index
    %c0_45 = arith.constant 0 : index
    %94 = vector.load %arg14[%c0_44, %c0_45] : memref<1x1xf32, #tpu.memory_space<vmem>>, vector<1x1xf32>
    %95 = vector.broadcast %94 : vector<1x1xf32> to vector<8x1xf32>
    %96 = arith.addf %93, %95 : vector<8x1xf32>
    %cst_46 = arith.constant 0.000000e+00 : f32
    %97 = vector.broadcast %cst_46 : f32 to vector<8x1xf32>
    %98 = arith.subf %97, %96 : vector<8x1xf32>
    %99 = math.exp %98 : vector<8x1xf32>
    %cst_47 = arith.constant 1.000000e+00 : f32
    %100 = vector.broadcast %cst_47 : f32 to vector<8x1xf32>
    %101 = arith.addf %100, %99 : vector<8x1xf32>
    %cst_48 = arith.constant 1.000000e+00 : f32
    %102 = vector.broadcast %cst_48 : f32 to vector<8x1xf32>
    %103 = arith.divf %102, %101 : vector<8x1xf32>
    %c0_49 = arith.constant 0 : index
    %c0_50 = arith.constant 0 : index
    %104 = vector.load %arg15[%c0_49, %c0_50] : memref<8x1xf32, #tpu.memory_space<vmem>>, vector<8x1xf32>
    tpu.vector_store %arg15[%c0_49, %c0_50], %103 {strides = array<i32>} : memref<8x1xf32, #tpu.memory_space<vmem>>, vector<8x1xf32>,
    return
  }
  func.func @transform_0(%arg0: i32) -> (i32, i32) {
    %c0_i32 = arith.constant 0 : i32
    %c0_i32_0 = arith.constant 0 : i32
    return %arg0, %c0_i32 : i32, i32
  }
  func.func @transform_1(%arg0: i32) -> (i32, i32) {
    %c0_i32 = arith.constant 0 : i32
    %c0_i32_0 = arith.constant 0 : i32
    %c0_i32_1 = arith.constant 0 : i32
    return %c0_i32, %c0_i32_0 : i32, i32
  }
  func.func @transform_2(%arg0: i32) -> (i32, i32) {
    %c0_i32 = arith.constant 0 : i32
    %c0_i32_0 = arith.constant 0 : i32
    %c0_i32_1 = arith.constant 0 : i32
    return %c0_i32, %c0_i32_0 : i32, i32
  }
  func.func @transform_3(%arg0: i32) -> (i32, i32) {
    %c0_i32 = arith.constant 0 : i32
    %c0_i32_0 = arith.constant 0 : i32
    %c0_i32_1 = arith.constant 0 : i32
    return %c0_i32, %c0_i32_0 : i32, i32
  }
  func.func @transform_4(%arg0: i32) -> (i32, i32) {
    %c0_i32 = arith.constant 0 : i32
    %c0_i32_0 = arith.constant 0 : i32
    %c0_i32_1 = arith.constant 0 : i32
    return %c0_i32, %c0_i32_0 : i32, i32
  }
  func.func @transform_5(%arg0: i32) -> (i32, i32) {
    %c0_i32 = arith.constant 0 : i32
    %c0_i32_0 = arith.constant 0 : i32
    %c0_i32_1 = arith.constant 0 : i32
    return %c0_i32, %c0_i32_0 : i32, i32
  }
  func.func @transform_6(%arg0: i32) -> (i32, i32) {
    %c0_i32 = arith.constant 0 : i32
    %c0_i32_0 = arith.constant 0 : i32
    %c0_i32_1 = arith.constant 0 : i32
    return %c0_i32, %c0_i32_0 : i32, i32
  }
  func.func @transform_7(%arg0: i32) -> (i32, i32) {
    %c0_i32 = arith.constant 0 : i32
    %c0_i32_0 = arith.constant 0 : i32
    %c0_i32_1 = arith.constant 0 : i32
    return %c0_i32, %c0_i32_0 : i32, i32
  }
  func.func @transform_8(%arg0: i32) -> (i32, i32) {
    %c0_i32 = arith.constant 0 : i32
    %c0_i32_0 = arith.constant 0 : i32
    %c0_i32_1 = arith.constant 0 : i32
    return %c0_i32, %c0_i32_0 : i32, i32
  }
  func.func @transform_9(%arg0: i32) -> (i32, i32) {
    %c0_i32 = arith.constant 0 : i32
    %c0_i32_0 = arith.constant 0 : i32
    %c0_i32_1 = arith.constant 0 : i32
    return %c0_i32, %c0_i32_0 : i32, i32
  }
  func.func @transform_10(%arg0: i32) -> (i32, i32) {
    %c0_i32 = arith.constant 0 : i32
    %c0_i32_0 = arith.constant 0 : i32
    %c0_i32_1 = arith.constant 0 : i32
    return %c0_i32, %c0_i32_0 : i32, i32
  }
  func.func @transform_11(%arg0: i32) -> (i32, i32) {
    %c0_i32 = arith.constant 0 : i32
    %c0_i32_0 = arith.constant 0 : i32
    %c0_i32_1 = arith.constant 0 : i32
    return %c0_i32, %c0_i32_0 : i32, i32
  }
  func.func @transform_12(%arg0: i32) -> (i32, i32) {
    %c0_i32 = arith.constant 0 : i32
    %c0_i32_0 = arith.constant 0 : i32
    %c0_i32_1 = arith.constant 0 : i32
    return %c0_i32, %c0_i32_0 : i32, i32
  }
  func.func @transform_13(%arg0: i32) -> (i32, i32) {
    %c0_i32 = arith.constant 0 : i32
    %c0_i32_0 = arith.constant 0 : i32
    %c0_i32_1 = arith.constant 0 : i32
    return %c0_i32, %c0_i32_0 : i32, i32
  }
  func.func @transform_14(%arg0: i32) -> (i32, i32) {
    %c0_i32 = arith.constant 0 : i32
    %c0_i32_0 = arith.constant 0 : i32
    return %arg0, %c0_i32 : i32, i32
  }
}

</mosaic_0001>

<bundles_post_ra>
// kernel: multi_nfwfm_forward.1
= control target key start
LH: loop header
LB: loop body
LE: loop exit
PB: predicated region body
PF: predicated region fallthrough
CT: control target
= control target key end

     0   :  { %v645_v0 = vmov 0   ;;  %v646_v1 = vmov 2   ;;  %v647_v3 = vmov 4   ;;  %v648_v4 = vmov 1   ;;  %s1268_s0 = inlined_call_operand.vmem [shape: s32[8,8], index: 0, kind: input, shape index: {}]   ;;  %s1269_s1 = inlined_call_operand.vmem [shape: f32[56,384], index: 1, kind: input, shape index: {}]   ;;  %s1270_s2 = inlined_call_operand.vmem [shape: f32[128,128], index: 2, kind: input, shape index: {}]   ;;  %s1271_s5 = inlined_call_operand.vmem [shape: f32[256,256], index: 5, kind: input, shape index: {}]   ;;  %s1272_s3 = inlined_call_operand.vmem [shape: f32[128,64], index: 3, kind: input, shape index: {}]   ;;  %s1273_s6 = inlined_call_operand.vmem [shape: f32[256,64], index: 6, kind: input, shape index: {}]   ;;  %s1274_s4 = inlined_call_operand.vmem [shape: f32[1,64], index: 4, kind: input, shape index: {}]   ;;  %s1275_s7 = inlined_call_operand.vmem [shape: f32[1,64], index: 7, kind: input, shape index: {}]   ;;  %s1276_s8 = inlined_call_operand.vmem [shape: f32[64,32], index: 8, kind: input, shape index: {}]   ;;  %s1277_s9 = inlined_call_operand.vmem [shape: f32[1,32], index: 9, kind: input, shape index: {}]   ;;  %s1278_s10 = inlined_call_operand.vmem [shape: f32[32,16], index: 10, kind: input, shape index: {}]   ;;  %s1279_s11 = inlined_call_operand.vmem [shape: f32[1,16], index: 11, kind: input, shape index: {}]   ;;  %s1280_s12 = inlined_call_operand.vmem [shape: f32[1,16], index: 12, kind: input, shape index: {}]   ;;  %s1281_s13 = inlined_call_operand.<no memory space> [shape: f32[1,1], index: 13, kind: input, shape index: {}]   ;;  %s1282_s14 = inlined_call_operand.vmem [shape: f32[8,1], index: 14, kind: output, shape index: {}]  }
   0x1   :  { %626 = vset.pattern.permute.xlu0 %v645_v0  ;;  %628 = vset.pattern.permute.xlu1 %v646_v1  ;;  %v51_v2 = vld [vmem:[%s1268_s0] sm:$0xff]  ;;  %v649_v5 = vmov 3   ;;  %v650_v6 = vmov 5   ;;  %v651_v7 = vmov 6   ;;  %v652_v8 = vmov 7   ;;  %v125_v9 = vld [vmem:[%s1269_s1 + $0x90] sm:$0xff] }
   0x2   :  { %53 = vperm.xlu0 %626, %v51_v2   ;;  %66 = vperm.xlu1 %628, %v51_v2   ;;  %v126_v10 = vld [vmem:[%s1269_s1 + $0x98] sm:$0xff]  ;;  %v127_v11 = vld [vmem:[%s1269_s1 + $0xa0] sm:$0xff]  ;;  %v124_v14 = vld [vmem:[%s1269_s1 + $0x88] sm:$0xff]  ;;  %v49_v37 = vlaneseq  ;;  %v653_v60 = vmov 0.0   ;;  %vm128_vm8 = vcmask 457728   ;;  %vm507_vm9 = vcmask 523264  }
   0x3   :  { %630 = vset.pattern.permute.xlu2 %v647_v3  ;;  %141 = vmatpush.msra.mxu0 %v125_v9  ;;  %v122_v12 = vld [vmem:[%s1269_s1 + $0x78] sm:$0xff]  ;;  %v123_v13 = vld [vmem:[%s1269_s1 + $0x80] sm:$0xff]  ;;  %v120_v16 = vld [vmem:[%s1269_s1 + $0x68] sm:$0xff]  ;;  %vm540_vm10 = vcmask 261120   ;;  %vm570_vm11 = vcmask 130048   ;;  %vm598_vm14 = vcmask 7168  }
   0x4   :  { %80 = vperm.xlu2 %630, %v51_v2   ;;  %161 = vmatpush.msra.mxu1 %v126_v10  ;;  %v119_v15 = vld [vmem:[%s1269_s1 + $0x60] sm:$0xff]  ;;  %v121_v17 = vld [vmem:[%s1269_s1 + $0x70] sm:$0xff]  ;;  %v116_v18 = vld [vmem:[%s1269_s1 + $0x48] sm:$0xff]  ;;  %v833_v46 = vand.u32 127, %v49_v37 }
   0x5   :  { %181 = vmatpush.msra.mxu2 %v127_v11  ;;  %142 = vmatpush.msra.mxu0 %v122_v12  ;;  %v117_v19 = vld [vmem:[%s1269_s1 + $0x50] sm:$0xff]  ;;  %v118_v20 = vld [vmem:[%s1269_s1 + $0x58] sm:$0xff]  ;;  %v115_v23 = vld [vmem:[%s1269_s1 + $0x40] sm:$0xff] }
   0x6   :  { %162 = vmatpush.msra.mxu1 %v123_v13  ;;  %v113_v21 = vld [vmem:[%s1269_s1 + $0x30] sm:$0xff]  ;;  %v114_v22 = vld [vmem:[%s1269_s1 + $0x38] sm:$0xff]  ;;  %v111_v25 = vld [vmem:[%s1269_s1 + $0x20] sm:$0xff] }
   0x7   :  { %182 = vmatpush.msra.mxu2 %v124_v14  ;;  %143 = vmatpush.msra.mxu0 %v119_v15  ;;  %v110_v24 = vld [vmem:[%s1269_s1 + $0x18] sm:$0xff]  ;;  %v112_v26 = vld [vmem:[%s1269_s1 + $0x28] sm:$0xff]  ;;  %v107_v27 = vld [vmem:[%s1269_s1] sm:$0xff] }
   0x8   :  { %163 = vmatpush.msra.mxu1 %v120_v16  ;;  %v108_v28 = vld [vmem:[%s1269_s1 + $0x8] sm:$0xff]  ;;  %v109_v29 = vld [vmem:[%s1269_s1 + $0x10] sm:$0xff]  ;;  %v207_v31 = vld [vmem:[%s1270_s2 + $0x78] sm:$0xff] }
   0x9   :  { %183 = vmatpush.msra.mxu2 %v121_v17  ;;  %144 = vmatpush.msra.mxu0 %v116_v18  ;;  %v206_v32 = vld [vmem:[%s1270_s2 + $0x70] sm:$0xff]  ;;  %v205_v33 = vld [vmem:[%s1270_s2 + $0x68] sm:$0xff]  ;;  %v204_v34 = vld [vmem:[%s1270_s2 + $0x60] sm:$0xff] }
   0xa   :  { %627 = vset.pattern.permute.xlu0 %v648_v4  ;;  %629 = vset.pattern.permute.xlu1 %v649_v5  ;;  %v300_v35 = vld [vmem:[%s1271_s5 + $0xf0] sm:$0xff]  ;;  %v298_v36 = vld [vmem:[%s1271_s5 + $0xe0] sm:$0xff]  ;;  %v203_v40 = vld [vmem:[%s1270_s2 + $0x58] sm:$0xff] }
   0xb   :  { %59 = vperm.xlu0 %627, %v51_v2   ;;  %73 = vperm.xlu1 %629, %v51_v2   ;;  %v296_v41 = vld [vmem:[%s1271_s5 + $0xd0] sm:$0xff]  ;;  %v330_v43 = vld [vmem:[%s1271_s5 + $0x1e0] sm:$0xff]  ;;  %v201_v49 = vld [vmem:[%s1270_s2 + $0x48] sm:$0xff] }
   0xc   :  { %631 = vset.pattern.permute.xlu2 %v650_v6  ;;  %164 = vmatpush.msra.mxu1 %v117_v19  ;;  %v332_v42 = vld [vmem:[%s1271_s5 + $0x1f0] sm:$0xff]  ;;  %v294_v45 = vld [vmem:[%s1271_s5 + $0xc0] sm:$0xff]  ;;  %v199_v57 = vld [vmem:[%s1270_s2 + $0x38] sm:$0xff] }
   0xd   :  { %87 = vperm.xlu2 %631, %v51_v2   ;;  %184 = vmatpush.msra.mxu2 %v118_v20  ;;  %v202_v44 = vld [vmem:[%s1270_s2 + $0x50] sm:$0xff]  ;;  %v326_v51 = vld [vmem:[%s1271_s5 + $0x1c0] sm:$0xff]  ;;  %v197_v4 = vld [vmem:[%s1270_s2 + $0x28] sm:$0xff] }
   0xe   :  { %145 = vmatpush.msra.mxu0 %v113_v21  ;;  %165 = vmatpush.msra.mxu1 %v114_v22  ;;  %v328_v47 = vld [vmem:[%s1271_s5 + $0x1d0] sm:$0xff]  ;;  %v200_v52 = vld [vmem:[%s1270_s2 + $0x40] sm:$0xff]  ;;  %v195_v15 = vld [vmem:[%s1270_s2 + $0x18] sm:$0xff] }
   0xf   :  { %185 = vmatpush.msra.mxu2 %v115_v23  ;;  %208 = vmatpush.msra.mxu3 %v207_v31  ;;  %v292_v50 = vld [vmem:[%s1271_s5 + $0xb0] sm:$0xff]  ;;  %v290_v53 = vld [vmem:[%s1271_s5 + $0xa0] sm:$0xff]  ;;  %v297_v37 = vld [vmem:[%s1271_s5 + $0xd8] sm:$0xff] }
  0x10   :  { %146 = vmatpush.msra.mxu0 %v110_v24  ;;  %166 = vmatpush.msra.mxu1 %v111_v25  ;;  %v324_v54 = vld [vmem:[%s1271_s5 + $0x1b0] sm:$0xff]  ;;  %v322_v59 = vld [vmem:[%s1271_s5 + $0x1a0] sm:$0xff] }
  0x11   :  { %186 = vmatpush.msra.mxu2 %v112_v26  ;;  %209 = vmatpush.msra.mxu3 %v206_v32  ;;  %v288_v58 = vld [vmem:[%s1271_s5 + $0x90] sm:$0xff]  ;;  %v286_v0 = vld [vmem:[%s1271_s5 + $0x80] sm:$0xff] }
  0x12   :  { %147 = vmatpush.msra.mxu0 %v107_v27  ;;  %167 = vmatpush.msra.mxu1 %v108_v28  ;;  %v198_v63 = vld [vmem:[%s1270_s2 + $0x30] sm:$0xff]  ;;  %v196_v10 = vld [vmem:[%s1270_s2 + $0x20] sm:$0xff]  ;;  %v193_v27 = vld [vmem:[%s1270_s2 + $0x8] sm:$0xff] }
  0x13   :  { %632 = vset.pattern.permute.xlu1 %v651_v7  ;;  %634 = vset.pattern.permute.xlu0 %v652_v8  ;;  %v284_v5 = vld [vmem:[%s1271_s5 + $0x70] sm:$0xff]  ;;  %v318_v7 = vld [vmem:[%s1271_s5 + $0x180] sm:$0xff] }
  0x14   :  { %94 = vperm.xlu1 %632, %v51_v2   ;;  %187 = vmatpush.msra.mxu2 %v109_v29  ;;  %v282_v11 = vld [vmem:[%s1271_s5 + $0x60] sm:$0xff]  ;;  %v316_v13 = vld [vmem:[%s1271_s5 + $0x170] sm:$0xff] }
  0x15   :  { %633 = vset.pattern.permute.xlu2 %v652_v8  ;;  %210 = vmatpush.msra.mxu3 %v205_v33  ;;  %v280_v16 = vld [vmem:[%s1271_s5 + $0x50] sm:$0xff]  ;;  %v314_v19 = vld [vmem:[%s1271_s5 + $0x160] sm:$0xff]  ;;  %v301_v33 = vld [vmem:[%s1271_s5 + $0xf8] sm:$0xff] }
  0x16   :  { %101 = vperm.xlu2 %633, %v51_v2   ;;  %334 = vmatpush.msrb.mxu1 %v300_v35  ;;  %v320_v2 = vld [vmem:[%s1271_s5 + $0x190] sm:$0xff]  ;;  %v278_v22 = vld [vmem:[%s1271_s5 + $0x40] sm:$0xff]  ;;  %v299_v35 = vld [vmem:[%s1271_s5 + $0xe8] sm:$0xff] }
  0x17   :  { %211 = vmatpush.msra.mxu3 %v204_v34  ;;  %354 = vmatpush.msrb.mxu2 %v332_v42  ;;  %v194_v21 = vld [vmem:[%s1270_s2 + $0x10] sm:$0xff]  ;;  %v192_v32 = vld [vmem:[%s1270_s2] sm:$0xff]  ;;  %v287_v42 = vld [vmem:[%s1271_s5 + $0x88] sm:$0xff] }
  0x18   :  { %335 = vmatpush.msrb.mxu1 %v298_v36  ;;  %v312_v25 = vld [vmem:[%s1271_s5 + $0x150] sm:$0xff]  ;;  %v274_v34 = vld [vmem:[%s1271_s5 + $0x20] sm:$0xff] }
  0x19   :  { %212 = vmatpush.msra.mxu3 %v203_v40  ;;  %355 = vmatpush.msrb.mxu2 %v330_v43  ;;  %v276_v28 = vld [vmem:[%s1271_s5 + $0x30] sm:$0xff]  ;;  %v291_v40 = vld [vmem:[%s1271_s5 + $0xa8] sm:$0xff]  ;;  %v285_v43 = vld [vmem:[%s1271_s5 + $0x78] sm:$0xff] }
  0x1a   :  { %336 = vmatpush.msrb.mxu1 %v296_v41  ;;  %v272_v36 = vld [vmem:[%s1271_s5 + $0x10] sm:$0xff]  ;;  %v289_v41 = vld [vmem:[%s1271_s5 + $0x98] sm:$0xff] }
  0x1b   :  { %213 = vmatpush.msra.mxu3 %v202_v44  ;;  %356 = vmatpush.msrb.mxu2 %v328_v47  ;;  %v283_v44 = vld [vmem:[%s1271_s5 + $0x68] sm:$0xff]  ;;  %v308_v47 = vld [vmem:[%s1271_s5 + $0x130] sm:$0xff] }
  0x1c   :  { %337 = vmatpush.msrb.mxu1 %v294_v45  ;;  %v281_v45 = vld [vmem:[%s1271_s5 + $0x58] sm:$0xff] }
  0x1d   :  { %214 = vmatpush.msra.mxu3 %v201_v49  ;;  %357 = vmatpush.msrb.mxu2 %v326_v51  ;;  %v306_v49 = vld [vmem:[%s1271_s5 + $0x120] sm:$0xff]  ;;  %v304_v51 = vld [vmem:[%s1271_s5 + $0x110] sm:$0xff] }
  0x1e   :  { %338 = vmatpush.msrb.mxu1 %v292_v50  ;;  %v277_v50 = vld [vmem:[%s1271_s5 + $0x38] sm:$0xff] }
  0x1f   :  { %215 = vmatpush.msra.mxu3 %v200_v52  ;;  %358 = vmatpush.msrb.mxu2 %v324_v54  ;;  %v275_v52 = vld [vmem:[%s1271_s5 + $0x28] sm:$0xff]  ;;  %v273_v54 = vld [vmem:[%s1271_s5 + $0x18] sm:$0xff] }
  0x20   :  { %339 = vmatpush.msrb.mxu1 %v290_v53  ;;  %v302_v53 = vld [vmem:[%s1271_s5 + $0x100] sm:$0xff] }
  0x21   :  { %216 = vmatpush.msra.mxu3 %v199_v57  ;;  %359 = vmatpush.msrb.mxu2 %v322_v59  ;;  %v243_v57 = vld [vmem:[%s1272_s3 + $0x70] sm:$0xff]  ;;  %v241_v59 = vld [vmem:[%s1272_s3 + $0x60] sm:$0xff] }
  0x22   :  { %340 = vmatpush.msrb.mxu1 %v288_v58  ;;  %v242_v58 = vld [vmem:[%s1272_s3 + $0x68] sm:$0xff] }
  0x23   :  { %217 = vmatpush.msra.mxu3 %v198_v63  ;;  %360 = vmatpush.msrb.mxu2 %v320_v2  ;;  %v429_v63 = vld [vmem:[%s1273_s6 + $0x68] sm:$0xff] }
  0x24   :  { %341 = vmatpush.msrb.mxu1 %v286_v0  ;;  %v239_v0 = vld [vmem:[%s1272_s3 + $0x50] sm:$0xff]  ;;  %v238_v2 = vld [vmem:[%s1272_s3 + $0x48] sm:$0xff] }
  0x25   :  { %218 = vmatpush.msra.mxu3 %v197_v4  ;;  %361 = vmatpush.msrb.mxu2 %v318_v7  ;;  %v237_v4 = vld [vmem:[%s1272_s3 + $0x40] sm:$0xff]  ;;  %v425_v7 = vld [vmem:[%s1273_s6 + $0x48] sm:$0xff] }
  0x26   :  { %342 = vmatpush.msrb.mxu1 %v284_v5  ;;  %v426_v5 = vld [vmem:[%s1273_s6 + $0x50] sm:$0xff] }
  0x27   :  { %219 = vmatpush.msra.mxu3 %v196_v10  ;;  %362 = vmatpush.msrb.mxu2 %v316_v13  ;;  %v233_v10 = vld [vmem:[%s1272_s3 + $0x20] sm:$0xff] }
  0x28   :  { %343 = vmatpush.msrb.mxu1 %v282_v11  ;;  %v232_v11 = vld [vmem:[%s1272_s3 + $0x18] sm:$0xff] }
  0x29   :  { %220 = vmatpush.msra.mxu3 %v195_v15  ;;  %363 = vmatpush.msrb.mxu2 %v314_v19  ;;  %v230_v15 = vld [vmem:[%s1272_s3 + $0x8] sm:$0xff] }
  0x2a   :  { %344 = vmatpush.msrb.mxu1 %v280_v16  ;;  %v229_v16 = vld [vmem:[%s1272_s3] sm:$0xff]  ;;  %v331_v19 = vld [vmem:[%s1271_s5 + $0x1e8] sm:$0xff] }
  0x2b   :  { %221 = vmatpush.msra.mxu3 %v194_v21  ;;  %364 = vmatpush.msrb.mxu2 %v312_v25  ;;  %v327_v21 = vld [vmem:[%s1271_s5 + $0x1c8] sm:$0xff] }
  0x2c   :  { %345 = vmatpush.msrb.mxu1 %v278_v22  ;;  %v325_v22 = vld [vmem:[%s1271_s5 + $0x1b8] sm:$0xff]  ;;  %v319_v25 = vld [vmem:[%s1271_s5 + $0x188] sm:$0xff] }
  0x2d   :  { %222 = vmatpush.msra.mxu3 %v193_v27  ;;  %v317_v27 = vld [vmem:[%s1271_s5 + $0x178] sm:$0xff] }
  0x2e   :  { %346 = vmatpush.msrb.mxu1 %v276_v28  ;;  %v423_v28 = vld [vmem:[%s1273_s6 + $0x38] sm:$0xff] }
  0x2f   :  { %223 = vmatpush.msra.mxu3 %v192_v32  ;;  %v421_v32 = vld [vmem:[%s1273_s6 + $0x28] sm:$0xff] }
  0x30   :  { %347 = vmatpush.msrb.mxu1 %v274_v34  ;;  %v420_v34 = vld [vmem:[%s1273_s6 + $0x20] sm:$0xff] }
  0x31   :  { %374 = vmatpush.msrb.mxu3 %v301_v33  ;;  %v311_v33 = vld [vmem:[%s1271_s5 + $0x148] sm:$0xff] }
  0x32   :  { %348 = vmatpush.msrb.mxu1 %v272_v36  ;;  %v419_v36 = vld [vmem:[%s1273_s6 + $0x18] sm:$0xff] }
  0x33   :  { %375 = vmatpush.msrb.mxu3 %v299_v35  ;;  %v309_v35 = vld [vmem:[%s1271_s5 + $0x138] sm:$0xff] }
  0x35   :  { %376 = vmatpush.msrb.mxu3 %v297_v37  ;;  %v307_v37 = vld [vmem:[%s1271_s5 + $0x128] sm:$0xff] }
  0x5e   :  { %v795_v30 = vpop.permute.xlu2 %80 }
  0x5f   :  { %vm82_vm4 = vcmp.eq.s32.totalorder %v833_v46, %v795_v30  ;;  %v310_v30 = vld [vmem:[%s1271_s5 + $0x140] sm:$0xff] }
  0x60   :  { %v608_v14 = vsel %vm82_vm4, 1.0, %v653_v60  ;;  %365 = vmatpush.msrb.mxu2 %v310_v30  ;;  %v422_v30 = vld [vmem:[%s1273_s6 + $0x30] sm:$0xff] }
  0x62   :  { %366 = vmatpush.msrb.mxu2 %v308_v47  ;;  %v443_v47 = vld [vmem:[%s1273_s6 + $0xd8] sm:$0xff] }
  0x64   :  { %367 = vmatpush.msrb.mxu2 %v306_v49  ;;  %v441_v49 = vld [vmem:[%s1273_s6 + $0xc8] sm:$0xff] }
  0x66   :  { %368 = vmatpush.msrb.mxu2 %v304_v51  ;;  %v439_v51 = vld [vmem:[%s1273_s6 + $0xb8] sm:$0xff] }
  0x67   :  { %v838_v48 = vpop.permute.xlu2 %87 }
  0x68   :  { %vm89_vm5 = vcmp.eq.s32.totalorder %v833_v46, %v838_v48  ;;  %v279_v48 = vld [vmem:[%s1271_s5 + $0x48] sm:$0xff]  ;;  %369 = vmatpush.msrb.mxu2 %v302_v53 }
  0x69   :  { %v609_v20 = vsel %vm89_vm5, 1.0, %v653_v60 }
  0x70   :  { %v102_v9 = vpop.permute.xlu2 %101 }
  0x71   :  { %vm103_vm6 = vcmp.eq.s32.totalorder %v833_v46, %v102_v9  ;;  %v234_v9 = vld [vmem:[%s1272_s3 + $0x28] sm:$0xff] }
  0x72   :  { %v611_v26 = vsel %vm103_vm6, 1.0, %v653_v60 }
  0x74   :  { %v54_v38 = vpop.permute.xlu0 %53  ;;  %v67_v39 = vpop.permute.xlu1 %66 }
  0x75   :  { %vm55_vm0 = vcmp.eq.s32.totalorder %v833_v46, %v54_v38  ;;  %vm68_vm1 = vcmp.eq.s32.totalorder %v833_v46, %v67_v39  ;;  %v295_v38 = vld [vmem:[%s1271_s5 + $0xc8] sm:$0xff]  ;;  %v293_v39 = vld [vmem:[%s1271_s5 + $0xb8] sm:$0xff] }
  0x76   :  { %v604_v61 = vsel %vm55_vm0, 1.0, %v653_v60  ;;  %v606_v3 = vsel %vm68_vm1, 1.0, %v653_v60  ;;  %377 = vmatpush.msrb.mxu3 %v295_v38  ;;  %v418_v38 = vld [vmem:[%s1273_s6 + $0x10] sm:$0xff] }
  0x78   :  { %378 = vmatpush.msrb.mxu3 %v293_v39  ;;  %v305_v39 = vld [vmem:[%s1271_s5 + $0x118] sm:$0xff] }
  0x7a   :  { %379 = vmatpush.msrb.mxu3 %v291_v40  ;;  %v417_v40 = vld [vmem:[%s1273_s6 + $0x8] sm:$0xff] }
  0x7c   :  { %380 = vmatpush.msrb.mxu3 %v289_v41  ;;  %v303_v41 = vld [vmem:[%s1271_s5 + $0x108] sm:$0xff] }
  0x7d   :  { %v60_v55 = vpop.permute.xlu0 %59  ;;  %v74_v56 = vpop.permute.xlu1 %73 }
  0x7e   :  { %vm61_vm2 = vcmp.eq.s32.totalorder %v833_v46, %v60_v55  ;;  %vm75_vm3 = vcmp.eq.s32.totalorder %v833_v46, %v74_v56  ;;  %381 = vmatpush.msrb.mxu3 %v287_v42  ;;  %v271_v55 = vld [vmem:[%s1271_s5 + $0x8] sm:$0xff]  ;;  %v244_v56 = vld [vmem:[%s1272_s3 + $0x78] sm:$0xff]  ;;  %v416_v42 = vld [vmem:[%s1273_s6] sm:$0xff] }
  0x7f   :  { %v605_v62 = vsel %vm61_vm2, 1.0, %v653_v60  ;;  %v607_v8 = vsel %vm75_vm3, 1.0, %v653_v60  ;;  %249 = vmatpush.msrb.mxu0 %v244_v56 }
  0x80   :  { %v64_v1 = vadd.f32 %v605_v62, %v604_v61  ;;  %382 = vmatpush.msrb.mxu3 %v285_v43  ;;  %v240_v61 = vld [vmem:[%s1272_s3 + $0x58] sm:$0xff]  ;;  %v430_v62 = vld [vmem:[%s1273_s6 + $0x70] sm:$0xff] }
  0x81   :  { %250 = vmatpush.msrb.mxu0 %v243_v57  ;;  %v447_v43 = vld [vmem:[%s1273_s6 + $0xf8] sm:$0xff] }
  0x82   :  { %v71_v6 = vadd.f32 %v606_v3, %v64_v1  ;;  %383 = vmatpush.msrb.mxu3 %v283_v44  ;;  %v428_v1 = vld [vmem:[%s1273_s6 + $0x60] sm:$0xff]  ;;  %v427_v3 = vld [vmem:[%s1273_s6 + $0x58] sm:$0xff]  ;;  %v446_v44 = vld [vmem:[%s1273_s6 + $0xf0] sm:$0xff] }
  0x83   :  { %251 = vmatpush.msrb.mxu0 %v242_v58  ;;  %v438_v58 = vld [vmem:[%s1273_s6 + $0xb0] sm:$0xff] }
  0x84   :  { %v78_v12 = vadd.f32 %v607_v8, %v71_v6  ;;  %384 = vmatpush.msrb.mxu3 %v281_v45  ;;  %v236_v6 = vld [vmem:[%s1272_s3 + $0x38] sm:$0xff]  ;;  %v235_v8 = vld [vmem:[%s1272_s3 + $0x30] sm:$0xff]  ;;  %v445_v45 = vld [vmem:[%s1273_s6 + $0xe8] sm:$0xff] }
  0x85   :  { %252 = vmatpush.msrb.mxu0 %v241_v59  ;;  %v437_v59 = vld [vmem:[%s1273_s6 + $0xa8] sm:$0xff] }
  0x86   :  { %v85_v17 = vadd.f32 %v608_v14, %v78_v12  ;;  %v95_v18 = vpop.permute.xlu1 %94  ;;  %385 = vmatpush.msrb.mxu3 %v279_v48  ;;  %v231_v14 = vld [vmem:[%s1272_s3 + $0x10] sm:$0xff] }
  0x87   :  { %vm96_vm7 = vcmp.eq.s32.totalorder %v833_v46, %v95_v18  ;;  %v270_v46 = vld [vmem:[%s1271_s5] sm:$0xff]  ;;  %253 = vmatpush.msrb.mxu0 %v240_v61  ;;  %v442_v48 = vld [vmem:[%s1273_s6 + $0xd0] sm:$0xff]  ;;  %v435_v61 = vld [vmem:[%s1273_s6 + $0x98] sm:$0xff] }
  0x88   :  { %v92_v23 = vadd.f32 %v609_v20, %v85_v17  ;;  %v610_v24 = vsel %vm96_vm7, 1.0, %v653_v60  ;;  %349 = vmatpush.msrb.mxu1 %v270_v46  ;;  %386 = vmatpush.msrb.mxu3 %v277_v50  ;;  %v431_v60 = vld [vmem:[%s1273_s6 + $0x78] sm:$0xff]  ;;  %v444_v46 = vld [vmem:[%s1273_s6 + $0xe0] sm:$0xff] }
  0x89   :  { %254 = vmatpush.msrb.mxu0 %v239_v0  ;;  %v333_v17 = vld [vmem:[%s1271_s5 + $0x1f8] sm:$0xff]  ;;  %v440_v50 = vld [vmem:[%s1273_s6 + $0xc0] sm:$0xff] }
  0x8a   :  { %v99_v29 = vadd.f32 %v610_v24, %v92_v23  ;;  %387 = vmatpush.msrb.mxu3 %v275_v52  ;;  %v329_v20 = vld [vmem:[%s1271_s5 + $0x1d8] sm:$0xff]  ;;  %v323_v23 = vld [vmem:[%s1271_s5 + $0x1a8] sm:$0xff]  ;;  %v432_v0 = vld [vmem:[%s1273_s6 + $0x80] sm:$0xff] }
  0x8b   :  { %255 = vmatpush.msrb.mxu0 %v238_v2  ;;  %v321_v24 = vld [vmem:[%s1271_s5 + $0x198] sm:$0xff]  ;;  %v501_v2 = vld [vmem:[%s1276_s8 + $0x30] sm:$0xff] }
  0x8c   :  { %v106_v31 = vadd.f32 %v611_v26, %v99_v29  ;;  %388 = vmatpush.msrb.mxu3 %v273_v54  ;;  %v424_v26 = vld [vmem:[%s1273_s6 + $0x40] sm:$0xff]  ;;  %v315_v29 = vld [vmem:[%s1271_s5 + $0x168] sm:$0xff] }
  0x8d   :  { %256 = vmatpush.msrb.mxu0 %v237_v4 }
  0x8e   :  { %612 = vmatmul.msk.f32.vlgmr.msra.gmra.mxu0 %vm128_vm8, %v106_v31  ;;  %613 = vmatmul.msk.f32.vlgmr.msra.gmra.mxu1 %vm128_vm8, %v106_v31 }
  0x8f   :  { %614 = vmatmul.msk.f32.vlgmr.msra.gmra.mxu2 %vm128_vm8, %v106_v31  ;;  %389 = vmatpush.msrb.mxu3 %v271_v55  ;;  %v313_v31 = vld [vmem:[%s1271_s5 + $0x158] sm:$0xff] }
  0x90   :  { %452 = vmatpush.msra.mxu1 %v431_v60  ;;  %257 = vmatpush.msrb.mxu0 %v236_v6  ;;  %v436_v60 = vld [vmem:[%s1273_s6 + $0xa0] sm:$0xff] }
  0x91   :  { %472 = vmatpush.msra.mxu2 %v447_v43 }
  0x92   :  { %453 = vmatpush.msra.mxu1 %v430_v62  ;;  %258 = vmatpush.msrb.mxu0 %v235_v8  ;;  %v434_v62 = vld [vmem:[%s1273_s6 + $0x90] sm:$0xff] }
  0x93   :  { %473 = vmatpush.msra.mxu2 %v446_v44 }
  0x94   :  { %454 = vmatpush.msra.mxu1 %v429_v63  ;;  %259 = vmatpush.msrb.mxu0 %v234_v9  ;;  %v433_v63 = vld [vmem:[%s1273_s6 + $0x88] sm:$0xff]  ;;  %v499_v9 = vld [vmem:[%s1276_s8 + $0x20] sm:$0xff] }
  0x95   :  { %474 = vmatpush.msra.mxu2 %v445_v45 }
  0x96   :  { %455 = vmatpush.msra.mxu1 %v428_v1  ;;  %260 = vmatpush.msrb.mxu0 %v233_v10  ;;  %v502_v1 = vld [vmem:[%s1276_s8 + $0x38] sm:$0xff] }
  0x97   :  { %475 = vmatpush.msra.mxu2 %v444_v46  ;;  %v498_v10 = vld [vmem:[%s1276_s8 + $0x18] sm:$0xff] }
  0x98   :  { %456 = vmatpush.msra.mxu1 %v427_v3  ;;  %261 = vmatpush.msrb.mxu0 %v232_v11  ;;  %v500_v3 = vld [vmem:[%s1276_s8 + $0x28] sm:$0xff]  ;;  %v497_v11 = vld [vmem:[%s1276_s8 + $0x10] sm:$0xff] }
  0x99   :  { %476 = vmatpush.msra.mxu2 %v443_v47 }
  0x9a   :  { %457 = vmatpush.msra.mxu1 %v426_v5  ;;  %262 = vmatpush.msrb.mxu0 %v231_v14  ;;  %v535_v14 = vld [vmem:[%s1278_s10 + $0x18] sm:$0xff] }
  0x9b   :  { %477 = vmatpush.msra.mxu2 %v442_v48 }
  0x9c   :  { %458 = vmatpush.msra.mxu1 %v425_v7  ;;  %263 = vmatpush.msrb.mxu0 %v230_v15  ;;  %v534_v15 = vld [vmem:[%s1278_s10 + $0x10] sm:$0xff] }
  0x9d   :  { %478 = vmatpush.msra.mxu2 %v441_v49 }
  0x9e   :  { %264 = vmatpush.msrb.mxu0 %v229_v16  ;;  %459 = vmatpush.msra.mxu1 %v424_v26  ;;  %v635_v16 = vld [vmem:[%s1274_s4] ss:$0 sm:$0xff] }
  0x9f   :  { %479 = vmatpush.msra.mxu2 %v440_v50 }
  0xa0   :  { %394 = vmatpush.msra.mxu0 %v333_v17  ;;  %460 = vmatpush.msra.mxu1 %v423_v28  ;;  %v636_v17 = vld [vmem:[%s1275_s7] ss:$0 sm:$0xff] }
  0xa1   :  { %480 = vmatpush.msra.mxu2 %v439_v51  ;;  %v532_v28 = vld [vmem:[%s1278_s10] sm:$0xff] }
  0xa2   :  { %395 = vmatpush.msra.mxu0 %v331_v19  ;;  %461 = vmatpush.msra.mxu1 %v422_v30 }
  0xa3   :  { %481 = vmatpush.msra.mxu2 %v438_v58 }
  0xa4   :  { %396 = vmatpush.msra.mxu0 %v329_v20  ;;  %462 = vmatpush.msra.mxu1 %v421_v32 }
  0xa5   :  { %482 = vmatpush.msra.mxu2 %v437_v59 }
  0xa6   :  { %397 = vmatpush.msra.mxu0 %v327_v21  ;;  %463 = vmatpush.msra.mxu1 %v420_v34  ;;  %v638_v34 = vld [vmem:[%s1279_s11] ss:$0 sm:$0xff] }
  0xa7   :  { %483 = vmatpush.msra.mxu2 %v436_v60 }
  0xa8   :  { %398 = vmatpush.msra.mxu0 %v325_v22  ;;  %464 = vmatpush.msra.mxu1 %v419_v36 }
  0xa9   :  { %484 = vmatpush.msra.mxu2 %v435_v61 }
  0xaa   :  { %399 = vmatpush.msra.mxu0 %v323_v23  ;;  %465 = vmatpush.msra.mxu1 %v418_v38 }
  0xab   :  { %485 = vmatpush.msra.mxu2 %v434_v62 }
  0xac   :  { %400 = vmatpush.msra.mxu0 %v321_v24  ;;  %466 = vmatpush.msra.mxu1 %v417_v40 }
  0xad   :  { %486 = vmatpush.msra.mxu2 %v433_v63 }
  0xae   :  { %401 = vmatpush.msra.mxu0 %v319_v25  ;;  %467 = vmatpush.msra.mxu1 %v416_v42 }
  0xaf   :  { %487 = vmatpush.msra.mxu2 %v432_v0 }
  0xb0   :  { %402 = vmatpush.msra.mxu0 %v317_v27  ;;  %v533_v27 = vld [vmem:[%s1278_s10 + $0x8] sm:$0xff] }
  0xb2   :  { %403 = vmatpush.msra.mxu0 %v315_v29  ;;  %v637_v29 = vld [vmem:[%s1277_s9] ss:$0 sm:$0xff] }
  0xb4   :  { %404 = vmatpush.msra.mxu0 %v313_v31 }
  0xb6   :  { %405 = vmatpush.msra.mxu0 %v311_v33  ;;  %v19_v33 = vstv %s1281_s13 }
  0xb7   :  { %20 = vst [vmem:[#allocation2] sm:$0x1] %v19_v33 }
  0xb8   :  { %406 = vmatpush.msra.mxu0 %v309_v35 }
  0xba   :  { %407 = vmatpush.msra.mxu0 %v307_v37  ;;  %v639_v37 = vld [vmem:[%s1280_s12] ss:$0 sm:$0xff] }
  0xbc   :  { %408 = vmatpush.msra.mxu0 %v305_v39 }
  0xbe   :  { %409 = vmatpush.msra.mxu0 %v303_v41  ;;  %v640_v41 = vld [vmem:[#allocation2] ss:$0 sm:$0xff] }
 0x10b   :  { %v1065_v12 = vpop.f32.mrf.mxu0  ;;  %v1067_v13 = vpop.f32.mrf.mxu1 }
 0x10c   :  { %224 = vmatmul.f32.vlgmr.msra.gmra.mxu3 %v1065_v12  ;;  %350 = vmatmul.f32.vlgmr.msrb.gmra.mxu1 %v1067_v13 }
 0x10d   :  { %519 = vmatpush.msra.mxu3 %v502_v1 }
 0x10f   :  { %520 = vmatpush.msra.mxu3 %v501_v2 }
 0x111   :  { %521 = vmatpush.msra.mxu3 %v500_v3 }
 0x112   :  { %v1083_v18 = vpop.f32.mrf.mxu2 }
 0x113   :  { %370 = vmatmul.f32.vlgmr.msrb.gmra.mxu2 %v1083_v18  ;;  %522 = vmatpush.msra.mxu3 %v499_v9 }
 0x114   :  { %390 = vmatmul.f32.vlgmr.msrb.gmra.mxu3 %v1067_v13 }
 0x115   :  { %523 = vmatpush.msra.mxu3 %v498_v10 }
 0x117   :  { %524 = vmatpush.msra.mxu3 %v497_v11 }
 0x189   :  { %v351_v54 = vpop.f32.mrf.mxu1 }
 0x18f   :  { %v225_v52 = vpop.f32.mrf.mxu3 }
 0x190   :  { %v228_v53 = vmul.f32 %v225_v52, %v1065_v12  ;;  %v496_v12 = vld [vmem:[%s1276_s8 + $0x8] sm:$0xff] }
 0x191   :  { %525 = vmatpush.msra.mxu3 %v496_v12 }
 0x192   :  { %265 = vmatmul.f32.vlgmr.msrb.gmra.mxu0 %v228_v53 }
 0x193   :  { %556 = vmatpush.msrb.mxu0 %v535_v14 }
 0x195   :  { %557 = vmatpush.msrb.mxu0 %v534_v15 }
 0x196   :  { %v371_v55 = vpop.f32.mrf.mxu2 }
 0x197   :  { %v372_v56 = vadd.f32 %v371_v55, %v351_v54  ;;  %v391_v5 = vpop.f32.mrf.mxu3  ;;  %558 = vmatpush.msrb.mxu0 %v533_v27 }
 0x199   :  { %v414_v57 = vmul.f32 %v372_v56, %v1067_v13  ;;  %v495_v13 = vld [vmem:[%s1276_s8] sm:$0xff]  ;;  %559 = vmatpush.msrb.mxu0 %v532_v28 }
 0x19a   :  { %410 = vmatmul.f32.vlgmr.msra.gmra.mxu0 %v1083_v18  ;;  %526 = vmatpush.msra.mxu3 %v495_v13 }
 0x19b   :  { %468 = vmatmul.f32.vlgmr.msra.gmra.mxu1 %v414_v57 }
 0x20f   :  { %v266_v4 = vpop.f32.mrf.mxu0 }
 0x210   :  { %v267_v19 = vadd.f32 %v635_v16, %v266_v4 }
 0x212   :  { %v269_v23 = vmax.f32 %v267_v19, 0.0 }
 0x217   :  { %v411_v6 = vpop.f32.mrf.mxu0 }
 0x218   :  { %v412_v7 = vadd.f32 %v411_v6, %v391_v5 }
 0x21a   :  { %v415_v8 = vmul.f32 %v412_v7, %v1083_v18  ;;  %v469_v18 = vpop.f32.mrf.mxu1 }
 0x21b   :  { %v470_v20 = vadd.f32 %v636_v17, %v469_v18 }
 0x21c   :  { %488 = vmatmul.f32.vlgmr.msra.gmra.mxu2 %v415_v8 }
 0x29f   :  { %v489_v21 = vpop.f32.mrf.mxu2 }
 0x2a0   :  { %v490_v22 = vadd.f32 %v489_v21, %v470_v20 }
 0x2a2   :  { %v492_v24 = vmax.f32 %v490_v22, 0.0 }
 0x2a4   :  { %v493_v25 = vadd.f32 %v492_v24, %v269_v23 }
 0x2a6   :  { %v494_v26 = vmul.f32 0.5, %v493_v25 }
 0x2a8   :  { %615 = vmatmul.msk.f32.vlgmr.msra.gmra.mxu3 %vm507_vm9, %v494_v26 }
 0x32b   :  { %v528_v30 = vpop.f32.mrf.mxu3 }
 0x32c   :  { %v529_v31 = vadd.f32 %v637_v29, %v528_v30 }
 0x32e   :  { %v531_v32 = vmax.f32 %v529_v31, 0.0 }
 0x330   :  { %616 = vmatmul.msk.f32.vlgmr.msrb.gmra.mxu0 %vm540_vm10, %v531_v32 }
 0x3ad   :  { %v561_v35 = vpop.f32.mrf.mxu0 }
 0x3ae   :  { %v562_v36 = vadd.f32 %v638_v34, %v561_v35 }
 0x3b0   :  { %v564_v38 = vmax.f32 %v562_v36, 0.0 }
 0x3b2   :  { %v569_v39 = vmul.f32 %v639_v37, %v564_v38 }
 0x3b4   :  { %v571_v40 = vsel %vm570_vm11, %v569_v39, 0.0 }
 0x3b5   :  { %572 = vadd.xlane.f32.xlu0 %v571_v40 }
 0x428   :  { %v573_v42 = vpop.xlane.xlu0 %572 }
 0x429   :  { %v578_v43 = vadd.f32 %v640_v41, %v573_v42 }
 0x42b   :  { %v579_v44 = vsub.f32 0.0, %v578_v43 }
 0x42d   :  { %v580_v45 = vmul.f32 1.442695, %v579_v44 }
 0x42f   :  { %641 = vpow2.f32 %v580_v45 }
 0x435   :  { %v642_v46 = vpop.eup %641 }
 0x436   :  { %v582_v47 = vadd.f32 1.0, %v642_v46 }
 0x438   :  { %643 = vrcp.f32 %v582_v47  ;;  %v594_v51 = vand.u32 2147483648, %v582_v47  ;;  %v592_v53 = vand.u32 2147483647, %v582_v47  ;;  %vm588_vm13 = vweird.f32 %v582_v47 }
 0x43a   :  { %v595_v55 = vor.u32 1.1754944e-38, %v594_v51  ;;  %vm593_vm0 = vcmp.eq.f32.partialorder %v592_v53, 8.507059e+37 }
 0x43e   :  { %v644_v48 = vpop.eup %643 }
 0x43f   :  { %v584_v49 = vmul.f32 %v644_v48, %v582_v47  ;;  %vm589_vm12 = vweird.f32 %v644_v48 }
 0x440   :  { %vm590_vm15 = vmor %vm588_vm13, %vm589_vm12 }
 0x441   :  { %v585_v50 = vsub.f32 1.0, %v584_v49 }
 0x443   :  { %v586_v52 = vmul.f32 %v644_v48, %v585_v50 }
 0x445   :  { %v587_v54 = vadd.f32 %v644_v48, %v586_v52 }
 0x447   :  { %v591_v56 = vsel %vm590_vm15, %v644_v48, %v587_v54 }
 0x448   :  { %v596_v57 = vsel %vm593_vm0, %v595_v55, %v591_v56 }
 0x449   :  { %599 = vst.msk [vmem:[%s1282_s14] sm:$0xff] %vm598_vm14, %v596_v57 }

</bundles_post_ra>
